<compile_context>
chip_gen: v7x
topology: tpu7x:2x2x1
jax: 0.10.0
libtpu: 0.0.40
codegen_flags: <defaults>
</compile_context>

<pallas_src>
import jax
import jax.numpy as jnp
import numpy as np
from jax.experimental import pallas as pl
from jax.experimental.pallas import tpu as pltpu

HIDDEN = 128


def _round_up(n, m):
    return ((n + m - 1) // m) * m


def _disc_kernel(x_ref, w1_ref, b1_ref, w2_ref, b2_ref, o_ref):
    # Layer 1: Linear(F, 128) + LeakyReLU(0.01).  MXU matmul, f32 accumulation.
    h = jnp.dot(x_ref[...], w1_ref[...], preferred_element_type=jnp.float32)  # (TB, 128)
    h = h + b1_ref[...]                                                       # (1, 128) broadcast
    h = jnp.where(h >= 0, h, 0.01 * h)                                        # LeakyReLU(0.01)

    # Layer 2: Linear(128, 1) as VPU multiply + XLU lane reduction.
    # w2 is lane-dense (1, 128); avoids a 1-output-column MXU matmul and a
    # sublane-major (128, 1) weight layout.
    z = jnp.sum(h * w2_ref[...], axis=-1, keepdims=True) + b2_ref[0, 0]       # (TB, 1)

    # Sigmoid (exact; z is only (TB, 1) so this is negligible).
    o_ref[...] = (1.0 / (1.0 + jnp.exp(-z))).astype(o_ref.dtype)


def discriminator_forward(x, w1, b1, w2, b2, *, block_b=256, use_bf16=False):
    """x: (B, F) float32 -> (B, 1) float32, matching the nn.Sequential forward.

    w1: (F, 128)   (transposed vs PyTorch Linear(F,128).weight)
    b1: (1, 128)
    w2: (1, 128)   (PyTorch Linear(128,1).weight layout, lane-dense)
    b2: (1, 1)
    """
    B, F = x.shape
    H = w1.shape[1]
    assert w1.shape == (F, H) and b1.shape == (1, H)
    assert w2.shape == (1, H) and b2.shape == (1, 1)

    # Pad the feature dim to a lane-dense multiple of 128.  Zero-padded x
    # columns hit zero-padded W1 rows, so the result is exact.
    Fp = _round_up(max(F, 128), 128)
    if Fp != F:
        x = jnp.pad(x, ((0, 0), (0, Fp - F)))
        w1 = jnp.pad(w1, ((0, Fp - F), (0, 0)))

    # Optionally halve the dominant HBM stream (x) and hit the MXU bf16 path.
    # Accumulation stays f32 via preferred_element_type; epilogue stays f32.
    if use_bf16:
        x = x.astype(jnp.bfloat16)
        w1 = w1.astype(jnp.bfloat16)

    # Batch tile: multiple of 16 (covers bf16 sublane packing as well as f32's
    # (8, 128) rule).  Modest size keeps double-buffered x blocks + resident
    # weights well inside even v5e's 16 MiB scoped-VMEM default.
    TB = min(block_b, _round_up(B, 16))
    Bp = _round_up(B, TB)
    if Bp != B:
        x = jnp.pad(x, ((0, Bp - B), (0, 0)))

    out = pl.pallas_call(
        _disc_kernel,
        out_shape=jax.ShapeDtypeStruct((Bp, 1), jnp.float32),
        grid=(Bp // TB,),
        in_specs=[
            pl.BlockSpec((TB, Fp), lambda i: (i, 0)),   # x   : streamed per batch tile
            pl.BlockSpec((Fp, H), lambda i: (0, 0)),    # W1  : resident in VMEM
            pl.BlockSpec((1, H), lambda i: (0, 0)),     # b1  : resident in VMEM
            pl.BlockSpec((1, H), lambda i: (0, 0)),     # w2  : resident, lane-dense (1,128)
            pl.BlockSpec(memory_space=pltpu.MemorySpace.SMEM),  # b2 : scalar in SMEM
        ],
        out_specs=pl.BlockSpec((TB, 1), lambda i: (i, 0)),
        compiler_params=pltpu.CompilerParams(
            dimension_semantics=("parallel",),          # megacore split on v7x
        ),
    )(x, w1, b1, w2, b2)

    # Drop batch padding rows.
    return out[:B]


def init_params(key, in_features):
    """Deterministic init mirroring torch.nn.Linear's U(-1/sqrt(fan_in), +1/sqrt(fan_in))."""
    k1, k2, k3, k4 = jax.random.split(key, 4)
    bound1 = 1.0 / np.sqrt(in_features)
    bound2 = 1.0 / np.sqrt(HIDDEN)
    w1 = jax.random.uniform(k1, (in_features, HIDDEN), jnp.float32, -bound1, bound1)
    b1 = jax.random.uniform(k2, (1, HIDDEN), jnp.float32, -bound1, bound1)
    w2 = jax.random.uniform(k3, (1, HIDDEN), jnp.float32, -bound2, bound2)  # Linear(128,1).weight layout
    b2 = jax.random.uniform(k4, (1, 1), jnp.float32, -bound2, bound2)
    return w1, b1, w2, b2


def reference_forward(x, w1, b1, w2, b2):
    h = x @ w1 + b1
    h = jnp.where(h >= 0, h, 0.01 * h)
    z = h @ w2.T + b2
    return jax.nn.sigmoid(z)


if __name__ == "__main__":
    batch = 8
    in_features = 64

    key = jax.random.PRNGKey(0)
    kx, kp = jax.random.split(key)
    x = jax.random.normal(kx, (batch, in_features), jnp.float32)
    w1, b1, w2, b2 = init_params(kp, in_features)

    ref = reference_forward(x, w1, b1, w2, b2)

    # Full-precision (f32) path — matches PyTorch semantics tightly.
    out = discriminator_forward(x, w1, b1, w2, b2)
    out = jax.block_until_ready(out)
    assert out.shape == (batch, 1)
    np.testing.assert_allclose(np.asarray(out), np.asarray(ref), rtol=1e-5, atol=1e-5)

    # bf16 input-stream path (memory-bound optimization for v6e/v7x).
    out_bf16 = discriminator_forward(x, w1, b1, w2, b2, use_bf16=True)
    out_bf16 = jax.block_until_ready(out_bf16)
    np.testing.assert_allclose(np.asarray(out_bf16), np.asarray(ref), rtol=2e-2, atol=2e-2)

    print("KERNEL_OK")
</pallas_src>

<mosaic_0001>
module attributes {stable_mosaic.version = 11 : i64} {
  func.func @_disc_kernel(%arg0: i32, %arg1: memref<16x128xf32, #tpu.memory_space<vmem>>, %arg2: memref<128x128xf32, #tpu.memory_space<vmem>>, %arg3: memref<1x128xf32, #tpu.memory_space<vmem>>, %arg4: memref<1x128xf32, #tpu.memory_space<vmem>>, %arg5: memref<1x1xf32, #tpu.memory_space<smem>>, %arg6: memref<16x1xf32, #tpu.memory_space<vmem>>) attributes {dimension_semantics = [#tpu.dimension_semantics<parallel>], iteration_bounds = array<i64: 1>, scalar_prefetch = 0 : i64, scratch_operands = 0 : i64, tpu.core_type = #tpu.core_type<tc>, window_params = [{transform_indices = @transform_0, window_bounds = array<i64: 16, 128>}, {pipeline_mode = #tpu.pipeline_mode<synchronous>, transform_indices = @transform_1, window_bounds = array<i64: 128, 128>}, {pipeline_mode = #tpu.pipeline_mode<synchronous>, transform_indices = @transform_2, window_bounds = array<i64: 1, 128>}, {pipeline_mode = #tpu.pipeline_mode<synchronous>, transform_indices = @transform_3, window_bounds = array<i64: 1, 128>}, {transform_indices = @transform_4, window_bounds = array<i64: 1, 1>}, {transform_indices = @transform_5, window_bounds = array<i64: 16, 1>}]} {
    %c0 = arith.constant 0 : index
    %c0_0 = arith.constant 0 : index
    %0 = vector.load %arg1[%c0, %c0_0] : memref<16x128xf32, #tpu.memory_space<vmem>>, vector<16x128xf32>
    %c0_1 = arith.constant 0 : index
    %c0_2 = arith.constant 0 : index
    %1 = vector.load %arg2[%c0_1, %c0_2] : memref<128x128xf32, #tpu.memory_space<vmem>>, vector<128x128xf32>
    %cst = arith.constant dense<0.000000e+00> : vector<16x128xf32>
    %2 = tpu.matmul %0, %1, %cst {dimension_numbers = #tpu.dot_dimension_numbers<[1], [0], [0], [1], [0, 0, 1, 1], [], []>} : vector<16x128xf32>, vector<128x128xf32>, vector<16x128xf32> -> vector<16x128xf32>
    %c0_3 = arith.constant 0 : index
    %c0_4 = arith.constant 0 : index
    %3 = vector.load %arg3[%c0_3, %c0_4] : memref<1x128xf32, #tpu.memory_space<vmem>>, vector<1x128xf32>
    %4 = vector.broadcast %3 : vector<1x128xf32> to vector<16x128xf32>
    %5 = arith.addf %2, %4 : vector<16x128xf32>
    %cst_5 = arith.constant 0.000000e+00 : f32
    %6 = vector.broadcast %cst_5 : f32 to vector<16x128xf32>
    %7 = arith.cmpf oge, %5, %6 : vector<16x128xf32>
    %cst_6 = arith.constant 0.00999999977 : f32
    %8 = vector.broadcast %cst_6 : f32 to vector<16x128xf32>
    %9 = arith.mulf %8, %5 : vector<16x128xf32>
    %10 = arith.select %7, %5, %9 : vector<16x128xi1>, vector<16x128xf32>
    %c0_7 = arith.constant 0 : index
    %c0_8 = arith.constant 0 : index
    %11 = vector.load %arg4[%c0_7, %c0_8] : memref<1x128xf32, #tpu.memory_space<vmem>>, vector<1x128xf32>
    %12 = vector.broadcast %11 : vector<1x128xf32> to vector<16x128xf32>
    %13 = arith.mulf %10, %12 : vector<16x128xf32>
    %cst_9 = arith.constant dense<0.000000e+00> : vector<16xf32>
    %14 = vector.multi_reduction <add>, %13, %cst_9 [1] : vector<16x128xf32> to vector<16xf32>
    %15 = vector.shape_cast %14 : vector<16xf32> to vector<16x1xf32>
    %c0_10 = arith.constant 0 : index
    %c0_11 = arith.constant 0 : index
    %16 = memref.load %arg5[%c0_10, %c0_11] : memref<1x1xf32, #tpu.memory_space<smem>>
    %17 = vector.broadcast %16 : f32 to vector<16x1xf32>
    %18 = arith.addf %15, %17 : vector<16x1xf32>
    %cst_12 = arith.constant 0.000000e+00 : f32
    %19 = vector.broadcast %cst_12 : f32 to vector<16x1xf32>
    %20 = arith.subf %19, %18 : vector<16x1xf32>
    %21 = math.exp %20 : vector<16x1xf32>
    %cst_13 = arith.constant 1.000000e+00 : f32
    %22 = vector.broadcast %cst_13 : f32 to vector<16x1xf32>
    %23 = arith.addf %22, %21 : vector<16x1xf32>
    %cst_14 = arith.constant 1.000000e+00 : f32
    %24 = vector.broadcast %cst_14 : f32 to vector<16x1xf32>
    %25 = arith.divf %24, %23 : vector<16x1xf32>
    %c0_15 = arith.constant 0 : index
    %c0_16 = arith.constant 0 : index
    %26 = vector.load %arg6[%c0_15, %c0_16] : memref<16x1xf32, #tpu.memory_space<vmem>>, vector<16x1xf32>
    tpu.vector_store %arg6[%c0_15, %c0_16], %25 {strides = array<i32>} : memref<16x1xf32, #tpu.memory_space<vmem>>, vector<16x1xf32>,
    return
  }
  func.func @transform_0(%arg0: i32) -> (i32, i32) {
    %c0_i32 = arith.constant 0 : i32
    %c0_i32_0 = arith.constant 0 : i32
    return %arg0, %c0_i32 : i32, i32
  }
  func.func @transform_1(%arg0: i32) -> (i32, i32) {
    %c0_i32 = arith.constant 0 : i32
    %c0_i32_0 = arith.constant 0 : i32
    %c0_i32_1 = arith.constant 0 : i32
    return %c0_i32, %c0_i32_0 : i32, i32
  }
  func.func @transform_2(%arg0: i32) -> (i32, i32) {
    %c0_i32 = arith.constant 0 : i32
    %c0_i32_0 = arith.constant 0 : i32
    %c0_i32_1 = arith.constant 0 : i32
    return %c0_i32, %c0_i32_0 : i32, i32
  }
  func.func @transform_3(%arg0: i32) -> (i32, i32) {
    %c0_i32 = arith.constant 0 : i32
    %c0_i32_0 = arith.constant 0 : i32
    %c0_i32_1 = arith.constant 0 : i32
    return %c0_i32, %c0_i32_0 : i32, i32
  }
  func.func @transform_4(%arg0: i32) -> (i32, i32) {
    %c0_i32 = arith.constant 0 : i32
    %c0_i32_0 = arith.constant 0 : i32
    %c0_i32_1 = arith.constant 0 : i32
    return %c0_i32, %c0_i32_0 : i32, i32
  }
  func.func @transform_5(%arg0: i32) -> (i32, i32) {
    %c0_i32 = arith.constant 0 : i32
    %c0_i32_0 = arith.constant 0 : i32
    return %arg0, %c0_i32 : i32, i32
  }
}

</mosaic_0001>

<bundles_post_ra>
// kernel: tpu_custom_call.1
= control target key start
LH: loop header
LB: loop body
LE: loop exit
PB: predicated region body
PF: predicated region fallthrough
CT: control target
= control target key end

     0   :  { %11 = vsyncpa [#allocation4], 0  ;;  %s413_s0 = inlined_call_operand.hbm [shape: f32[16,128], index: 0, kind: input, shape index: {}]   ;;  %s414_s1 = inlined_call_operand.hbm [shape: f32[128,128], index: 1, kind: input, shape index: {}]   ;;  %s415_s2 = inlined_call_operand.vmem [shape: f32[1,128], index: 2, kind: input, shape index: {}]   ;;  %s416_s3 = inlined_call_operand.vmem [shape: f32[1,128], index: 3, kind: input, shape index: {}]   ;;  %s417_s4 = inlined_call_operand.<no memory space> [shape: f32[1,1], index: 4, kind: input, shape index: {}]   ;;  %s418_s5 = inlined_call_operand.vmem [shape: f32[16,1], index: 5, kind: output, shape index: {}]  }
   0x1   :  { %12 = vsyncpa [#allocation6], 0  ;;  %s340_s18 = smov [#allocation3]   ;;  %s292_s22 = scalar_lea.hbm %s413_s0, 256 }
   0x2   :  { %s18_s19 = sshll.u32 %s340_s18, 4  ;;  %p293_p0 = scmp.ne.s32.totalorder %s413_s0, %s292_s22  ;;  %s19_s19 = int_to_ptr.vmem [resolvable:$true] %s18_s19 }
   0x3   :  { %p296_p1 = scmp.lt.u32.totalorder %s292_s22, %s413_s0 }
   0x5   :  { %p298_p2 = pnand %p296_p1, %p293_p0 }
   0x7   :  { %301 = shalt.err (!%p298_p2)
}
   0x8   :  { %s302_s27 = scalar_lea.vmem %s19_s19, 256  ;;  %p307_p4 = scmp.lt.s32.totalorder %s19_s19, %s19_s19 }
   0x9   :  { %p303_p3 = scmp.ne.s32.totalorder %s19_s19, %s302_s27  ;;  %p308_p5 = scmp.lt.s32.totalorder %s302_s27, %s302_s27 }
   0xb   :  { %p309_p6 = por %p308_p5, %p307_p4 }
   0xd   :  { %p310_p7 = pnand %p309_p6, %p303_p3 }
   0xf   :  { %313 = shalt.err (!%p310_p7)
}
  0x10   :  { %s341_s28 = smov 128   ;;  %s342_s29 = smov 8  }
  0x11   :  { %24 = dma.hbm_to_vmem [thread:$0]  %s413_s0, 256, %s19_s19, [#allocation4], %s341_s28, %s341_s28, %s342_s29  }
  0x12   :  { %s343_s7 = smov [#allocation5]   ;;  %s314_s11 = scalar_lea.hbm %s414_s1, 2048 }
  0x13   :  { %s30_s8 = sshll.u32 %s343_s7, 4  ;;  %p315_p8 = scmp.ne.s32.totalorder %s414_s1, %s314_s11  ;;  %s31_s8 = int_to_ptr.vmem [resolvable:$true] %s30_s8 }
  0x14   :  { %p318_p9 = scmp.lt.u32.totalorder %s314_s11, %s414_s1 }
  0x16   :  { %p320_p10 = pnand %p318_p9, %p315_p8 }
  0x18   :  { %323 = shalt.err (!%p320_p10)
}
  0x19   :  { %s324_s16 = scalar_lea.vmem %s31_s8, 2048  ;;  %p329_p12 = scmp.lt.s32.totalorder %s31_s8, %s31_s8 }
  0x1a   :  { %p325_p11 = scmp.ne.s32.totalorder %s31_s8, %s324_s16  ;;  %p330_p13 = scmp.lt.s32.totalorder %s324_s16, %s324_s16 }
  0x1c   :  { %p331_p0 = por %p330_p13, %p329_p12 }
  0x1e   :  { %p332_p1 = pnand %p331_p0, %p325_p11 }
  0x20   :  { %335 = shalt.err (!%p332_p1)
}
  0x21   :  { %36 = dma.hbm_to_vmem [thread:$0]  %s414_s1, 2048, %s31_s8, [#allocation6], %s341_s28, %s341_s28, %s342_s29  }
  0x22   :  { %336 = dma.done.wait [#allocation4], 256  }
  0x23   :  { %337 = vsyncadd [#allocation4], 4294967040 }
  0x24   :  { %338 = dma.done.wait [#allocation6], 2048  }
  0x25   :  { %339 = vsyncadd [#allocation6], 4294965248  ;;  %v51_v0 = vld [vmem:[#allocation5] sm:$0xff]  ;;  %v52_v1 = vld [vmem:[#allocation5 + $0x8] sm:$0xff]  ;;  %v169_v38 = vstv %s417_s4  ;;  %vm184_vm2 = vcmask 7168  }
  0x26   :  { %v53_v2 = vld [vmem:[#allocation5 + $0x10] sm:$0xff]  ;;  %v248_v3 = vpack.c.bf16 %v52_v1, %v51_v0  ;;  %v54_v4 = vld [vmem:[#allocation5 + $0x18] sm:$0xff]  ;;  %v55_v6 = vld [vmem:[#allocation5 + $0x20] sm:$0xff] }
  0x27   :  { %v252_v5 = vpack.c.bf16 %v54_v4, %v53_v2  ;;  %v56_v7 = vld [vmem:[#allocation5 + $0x28] sm:$0xff]  ;;  %v49_v9 = vld [vmem:[#allocation3] sm:$0xff]  ;;  %v58_v11 = vld [vmem:[#allocation5 + $0x38] sm:$0xff] }
  0x28   :  { %249 = vmatprep.subr.bf16.mxu0 %v248_v3  ;;  %v256_v8 = vpack.c.bf16 %v56_v7, %v55_v6  ;;  %v57_v10 = vld [vmem:[#allocation5 + $0x30] sm:$0xff]  ;;  %245 = vmatprep.mubr.f32.mxu0 %v49_v9  ;;  %v59_v13 = vld [vmem:[#allocation5 + $0x40] sm:$0xff]  ;;  %v60_v14 = vld [vmem:[#allocation5 + $0x48] sm:$0xff] }
  0x29   :  { %251 = vmatpush3.bf16.msra.mxu0 %v248_v3  ;;  %v260_v12 = vpack.c.bf16 %v58_v11, %v57_v10  ;;  %v264_v15 = vpack.c.bf16 %v60_v14, %v59_v13  ;;  %v61_v16 = vld [vmem:[#allocation5 + $0x50] sm:$0xff]  ;;  %v62_v17 = vld [vmem:[#allocation5 + $0x58] sm:$0xff]  ;;  %v63_v19 = vld [vmem:[#allocation5 + $0x60] sm:$0xff] }
  0x2a   :  { %253 = vmatprep.subr.bf16.mxu0 %v252_v5  ;;  %v268_v18 = vpack.c.bf16 %v62_v17, %v61_v16  ;;  %v64_v20 = vld [vmem:[#allocation5 + $0x68] sm:$0xff]  ;;  %v65_v22 = vld [vmem:[#allocation5 + $0x70] sm:$0xff]  ;;  %v66_v23 = vld [vmem:[#allocation5 + $0x78] sm:$0xff] }
  0x2b   :  { %v272_v21 = vpack.c.bf16 %v64_v20, %v63_v19  ;;  %v276_v24 = vpack.c.bf16 %v66_v23, %v65_v22  ;;  %v50_v25 = vld [vmem:[#allocation3 + $0x8] sm:$0xff]  ;;  %v193_v26 = vld [vmem:[%s415_s2] ss:$0 sm:$0xff] }
  0x2c   :  { %v194_v31 = vld [vmem:[%s416_s3] ss:$0 sm:$0xff] }
  0x2d   :  { %255 = vmatpush3.bf16.msra.mxu0 %v252_v5 }
  0x2e   :  { %257 = vmatprep.subr.bf16.mxu0 %v256_v8 }
  0x31   :  { %259 = vmatpush3.bf16.msra.mxu0 %v256_v8 }
  0x32   :  { %261 = vmatprep.subr.bf16.mxu0 %v260_v12 }
  0x35   :  { %263 = vmatpush3.bf16.msra.mxu0 %v260_v12 }
  0x36   :  { %265 = vmatprep.subr.bf16.mxu0 %v264_v15 }
  0x39   :  { %267 = vmatpush3.bf16.msra.mxu0 %v264_v15 }
  0x3a   :  { %269 = vmatprep.subr.bf16.mxu0 %v268_v18 }
  0x3d   :  { %271 = vmatpush3.bf16.msra.mxu0 %v268_v18 }
  0x3e   :  { %273 = vmatprep.subr.bf16.mxu0 %v272_v21 }
  0x41   :  { %275 = vmatpush3.bf16.msra.mxu0 %v272_v21 }
  0x42   :  { %277 = vmatprep.subr.bf16.mxu0 %v276_v24 }
  0x45   :  { %279 = vmatpush3.bf16.msra.mxu0 %v276_v24 }
  0x48   :  { %246 = vmatmul.mubr.f32.vlgmr.msra.gmra.mrb[0].mxu0 %v50_v25 }
 0x11b   :  { %v247_v27 = vpop.f32.mrb[0].mxu0 }
 0x11c   :  { %v146_v28 = vadd.f32 %v247_v27, %v193_v26  ;;  %v140_v29 = vpop.f32.mrb[1].mxu0 }
 0x11d   :  { %v141_v30 = vadd.f32 %v193_v26, %v140_v29 }
 0x11e   :  { %v152_v32 = vmul.f32 0.01, %v146_v28  ;;  %vm150_vm1 = vcmp.ge.f32.partialorder %v146_v28, 0.0 }
 0x11f   :  { %v151_v33 = vmul.f32 0.01, %v141_v30  ;;  %vm149_vm0 = vcmp.ge.f32.partialorder %v141_v30, 0.0 }
 0x120   :  { %v154_v36 = vsel %vm150_vm1, %v146_v28, %v152_v32 }
 0x121   :  { %v153_v34 = vsel %vm149_vm0, %v141_v30, %v151_v33  ;;  %v163_v37 = vmul.f32 %v194_v31, %v154_v36 }
 0x122   :  { %v162_v35 = vmul.f32 %v194_v31, %v153_v34 }
 0x124   :  { %164 = vadd.xlane.f32.xlu0 %v162_v35 }
 0x128   :  { %166 = vadd.xlane.f32.xlu0 %v163_v37 }
 0x1b1   :  { %v165_v39 = vpop.xlane.xlu0 %164 }
 0x1b2   :  { %v170_v40 = vadd.f32 %v169_v38, %v165_v39 }
 0x1b4   :  { %v172_v41 = vsub.f32 0.0, %v170_v40 }
 0x1b5   :  { %v167_v42 = vpop.xlane.xlu0 %166 }
 0x1b6   :  { %v174_v43 = vmul.f32 1.442695, %v172_v41  ;;  %v171_v44 = vadd.f32 %v169_v38, %v167_v42 }
 0x1b8   :  { %284 = vpow2.f32 %v174_v43  ;;  %v173_v45 = vsub.f32 0.0, %v171_v44 }
 0x1ba   :  { %v176_v46 = vmul.f32 1.442695, %v173_v45 }
 0x1bc   :  { %286 = vpow2.f32 %v176_v46 }
 0x1c2   :  { %v285_v47 = vpop.eup %284 }
 0x1c3   :  { %v178_v48 = vadd.f32 1.0, %v285_v47 }
 0x1c5   :  { %288 = vrcp.f32 %v178_v48 }
 0x1c6   :  { %v287_v49 = vpop.eup %286 }
 0x1c7   :  { %v179_v50 = vadd.f32 1.0, %v287_v49 }
 0x1c9   :  { %290 = vrcp.f32 %v179_v50 }
 0x1cf   :  { %v289_v51 = vpop.eup %288 }
 0x1d0   :  { %185 = vst.msk [vmem:[%s418_s5] sm:$0xff] %vm184_vm2, %v289_v51 }
 0x1d3   :  { %v291_v52 = vpop.eup %290 }
 0x1d4   :  { %186 = vst.msk [vmem:[%s418_s5 + $0x8] sm:$0xff] %vm184_vm2, %v291_v52 }
 0x1d5   :  { %191 = vsyncpa [#allocation4], 1 }
 0x1d6   :  { %192 = vsyncpa [#allocation6], 1 }

</bundles_post_ra>
